<compile_context>
chip_gen: v6e
topology: v6e:2x2x1
jax: 0.10.0
libtpu: 0.0.40
codegen_flags: <defaults>
</compile_context>

<pallas_src>
import functools

import numpy as np
import jax
import jax.numpy as jnp
from jax.experimental import pallas as pl
from jax.experimental.pallas import tpu as pltpu


def make_idk_filters(kernel_size: int, out_channel: int) -> np.ndarray:
    """Deterministic 'idk' init from IdealDelayKernels.__init__ -> (C, K, K)."""
    f = np.zeros((out_channel, kernel_size, kernel_size), np.float32)
    idx = -1
    offset = (kernel_size - 3) // 2
    for i in range(offset, kernel_size - offset):
        for j in range(offset, kernel_size - offset):
            if i == kernel_size // 2 and j == kernel_size // 2:
                continue
            idx += 1
            f[idx, i, j] = 1.0
    if out_channel > 9:
        offset = (kernel_size - 3) // 2 + 1
        for i in range(0, kernel_size, offset):
            for j in range(0, kernel_size, offset):
                if i == kernel_size // 2 and j == kernel_size // 2:
                    continue
                idx += 1
                f[idx, i, j] = 1.0
    return f


def _idk_kernel(x_ref, o_ref, pad_ref, *, taps, p, H, W):
    """One grid step: a (TN, TD) batch of depth slices.

    x_ref:   (TN, TD, H, W)        input slices (VMEM)
    o_ref:   (TN, 1+C, TD, H, W)   final-layout output block (VMEM)
    pad_ref: (TN, TD, H+2p, W+2p)  zero-halo scratch (VMEM)
    taps:    static python list; taps[c] = [(i, j, val), ...] nonzero filter taps
    """
    x = x_ref[...]

    # Build the zero-padded halo in VMEM (replaces a wrapper-side jnp.pad pass).
    pad_ref[...] = jnp.zeros_like(pad_ref)
    pad_ref[:, :, p:p + H, p:p + W] = x

    # Channel 0: identity term of torch.cat((x, short_range), dim=1).
    o_ref[:, 0, :, :, :] = x

    # Delay channels: cross-correlation with trace-time-known filters -> each
    # channel is a sum of statically shifted slices (one slice for 'idk' init).
    for c, tap_list in enumerate(taps):
        if not tap_list:                       # all-zero filter channel
            o_ref[:, c + 1, :, :, :] = jnp.zeros_like(x)
            continue
        acc = None
        for (i, j, val) in tap_list:
            term = pad_ref[:, :, i:i + H, j:j + W]
            if val != 1.0:
                term = term * jnp.float32(val)
            acc = term if acc is None else acc + term
        o_ref[:, c + 1, :, :, :] = acc.astype(o_ref.dtype)


def _largest_divisor_leq(n, limit):
    limit = max(1, min(n, limit))
    for t in range(limit, 0, -1):
        if n % t == 0:
            return t
    return 1


def _vmem_plane_bytes(h, w, itemsize):
    """VMEM footprint of one (h, w) plane after (sublane, 128-lane) tile padding."""
    sublane = 8 * max(1, 4 // itemsize)
    hp = ((h + sublane - 1) // sublane) * sublane
    wp = ((w + 127) // 128) * 128
    return hp * wp * itemsize


def ideal_delay_kernels_forward(x, filt):
    """x: (N, D, H, W), filt: (C, K, K) trace-time constant
       -> (N, 1+C, D, H, W), matching the PyTorch module's forward."""
    filt = np.asarray(filt, dtype=np.float32)
    N, D, H, W = x.shape
    C, K, _ = filt.shape
    p = (K - 1) // 2
    Hp, Wp = H + 2 * p, W + 2 * p
    itemsize = jnp.dtype(x.dtype).itemsize

    # Static per-channel nonzero taps (the 'idk' filters are one-hot shifts).
    # TODO(synk): if the filter must be runtime-dynamic (trained weights fed at
    # run time), pass it via an SMEM input instead of trace-time specialization.
    taps = []
    for c in range(C):
        taps.append([(int(i), int(j), float(filt[c, i, j]))
                     for i in range(K) for j in range(K)
                     if filt[c, i, j] != 0.0])

    # Batch as many (n, d) slices per grid step as a conservative VMEM budget
    # allows: double-buffered in + out blocks plus the halo scratch, counted
    # with (sublane, 128-lane) padding so small-W demos don't blow up VMEM.
    try:
        vmem_cap = pltpu.get_tpu_info().vmem_capacity_bytes
    except Exception:  # pragma: no cover - emulator / older runtimes
        vmem_cap = 64 * 1024 * 1024
    budget = min(16 * 1024 * 1024, vmem_cap // 8)   # safe on v5e/v6e/v7x
    per_slice = ((2 * (1 + C) + 2) * _vmem_plane_bytes(H, W, itemsize)
                 + _vmem_plane_bytes(Hp, Wp, itemsize))
    max_slices = max(1, budget // per_slice)
    TD = _largest_divisor_leq(D, max_slices)
    TN = _largest_divisor_leq(N, max(1, max_slices // TD))

    kernel = functools.partial(_idk_kernel, taps=taps, p=p, H=H, W=W)

    return pl.pallas_call(
        kernel,
        out_shape=jax.ShapeDtypeStruct((N, 1 + C, D, H, W), x.dtype),
        grid_spec=pltpu.PrefetchScalarGridSpec(
            num_scalar_prefetch=0,
            grid=(N // TN, D // TD),
            in_specs=[
                pl.BlockSpec((TN, TD, H, W), lambda ni, di: (ni, di, 0, 0)),
            ],
            out_specs=pl.BlockSpec((TN, 1 + C, TD, H, W),
                                   lambda ni, di: (ni, 0, di, 0, 0)),
            scratch_shapes=[pltpu.VMEM((TN, TD, Hp, Wp), x.dtype)],
        ),
        compiler_params=pltpu.CompilerParams(
            dimension_semantics=("parallel", "parallel"),
            vmem_limit_bytes=32 * 1024 * 1024,
        ),
    )(x)


if __name__ == "__main__":
    kernel_size = 3
    out_channel = 8          # 8 ideal-delay (shift) kernels around the center
    N, D, H, W = 2, 4, 16, 16

    key = jax.random.PRNGKey(0)
    x = jax.random.normal(key, (N, D, H, W), dtype=jnp.float32)
    filt = make_idk_filters(kernel_size, out_channel)

    out = jax.block_until_ready(ideal_delay_kernels_forward(x, filt))
    assert out.shape == (N, 1 + out_channel, D, H, W), out.shape

    # Reference (same cross-correlation as PyTorch conv3d with depth-1 kernel).
    p = (kernel_size - 1) // 2
    xr = x.reshape(N * D, 1, H, W)
    wr = jnp.asarray(filt).reshape(out_channel, 1, kernel_size, kernel_size)
    ref_short = jax.lax.conv_general_dilated(
        xr, wr, window_strides=(1, 1), padding=[(p, p), (p, p)],
        dimension_numbers=("NCHW", "OIHW", "NCHW"))
    ref_short = ref_short.reshape(N, D, out_channel, H, W).transpose(0, 2, 1, 3, 4)
    ref = jnp.concatenate([x[:, None], ref_short], axis=1)
    np.testing.assert_allclose(np.asarray(out), np.asarray(ref), rtol=1e-5, atol=1e-5)

    print("KERNEL_OK")
</pallas_src>

<mosaic_0001>
module attributes {stable_mosaic.version = 11 : i64} {
  func.func @_idk_kernel(%arg0: i32, %arg1: i32, %arg2: memref<2x4x16x16xf32, #tpu.memory_space<vmem>>, %arg3: memref<2x9x4x16x16xf32, #tpu.memory_space<vmem>>, %arg4: memref<2x4x18x18xf32, #tpu.memory_space<vmem>>) attributes {dimension_semantics = [#tpu.dimension_semantics<parallel>, #tpu.dimension_semantics<parallel>], iteration_bounds = array<i64: 1, 1>, scalar_prefetch = 0 : i64, scratch_operands = 1 : i64, tpu.core_type = #tpu.core_type<tc>, window_params = [{transform_indices = @transform_0, window_bounds = array<i64: 2, 4, 16, 16>}, {transform_indices = @transform_1, window_bounds = array<i64: 2, 9, 4, 16, 16>}]} {
    %c0 = arith.constant 0 : index
    %c0_0 = arith.constant 0 : index
    %c0_1 = arith.constant 0 : index
    %c0_2 = arith.constant 0 : index
    %0 = vector.load %arg2[%c0, %c0_0, %c0_1, %c0_2] : memref<2x4x16x16xf32, #tpu.memory_space<vmem>>, vector<2x4x16x16xf32>
    %cst = arith.constant 0.000000e+00 : f32
    %1 = vector.broadcast %cst : f32 to vector<2x4x18x18xf32>
    %c0_3 = arith.constant 0 : index
    %c0_4 = arith.constant 0 : index
    %c0_5 = arith.constant 0 : index
    %c0_6 = arith.constant 0 : index
    %2 = vector.load %arg4[%c0_3, %c0_4, %c0_5, %c0_6] : memref<2x4x18x18xf32, #tpu.memory_space<vmem>>, vector<2x4x18x18xf32>
    tpu.vector_store %arg4[%c0_3, %c0_4, %c0_5, %c0_6], %1 {strides = array<i32>} : memref<2x4x18x18xf32, #tpu.memory_space<vmem>>, vector<2x4x18x18xf32>,
    %c0_7 = arith.constant 0 : index
    %c0_8 = arith.constant 0 : index
    %c1 = arith.constant 1 : index
    %c1_9 = arith.constant 1 : index
    %3 = vector.load %arg4[%c0_7, %c0_8, %c1, %c1_9] : memref<2x4x18x18xf32, #tpu.memory_space<vmem>>, vector<2x4x16x16xf32>
    tpu.vector_store %arg4[%c0_7, %c0_8, %c1, %c1_9], %0 {strides = array<i32>} : memref<2x4x18x18xf32, #tpu.memory_space<vmem>>, vector<2x4x16x16xf32>,
    %c0_10 = arith.constant 0 : index
    %c0_11 = arith.constant 0 : index
    %c0_12 = arith.constant 0 : index
    %c0_13 = arith.constant 0 : index
    %c0_14 = arith.constant 0 : index
    %4 = vector.load %arg3[%c0_10, %c0_11, %c0_12, %c0_13, %c0_14] : memref<2x9x4x16x16xf32, #tpu.memory_space<vmem>>, vector<2x1x4x16x16xf32>
    %5 = vector.shape_cast %4 : vector<2x1x4x16x16xf32> to vector<2x4x16x16xf32>
    %6 = vector.shape_cast %0 : vector<2x4x16x16xf32> to vector<2x1x4x16x16xf32>
    tpu.vector_store %arg3[%c0_10, %c0_11, %c0_12, %c0_13, %c0_14], %6 {strides = array<i32>} : memref<2x9x4x16x16xf32, #tpu.memory_space<vmem>>, vector<2x1x4x16x16xf32>,
    %c0_15 = arith.constant 0 : index
    %c0_16 = arith.constant 0 : index
    %c0_17 = arith.constant 0 : index
    %c0_18 = arith.constant 0 : index
    %7 = vector.load %arg4[%c0_15, %c0_16, %c0_17, %c0_18] : memref<2x4x18x18xf32, #tpu.memory_space<vmem>>, vector<2x4x16x16xf32>
    %c0_19 = arith.constant 0 : index
    %c1_20 = arith.constant 1 : index
    %c0_21 = arith.constant 0 : index
    %c0_22 = arith.constant 0 : index
    %c0_23 = arith.constant 0 : index
    %8 = vector.load %arg3[%c0_19, %c1_20, %c0_21, %c0_22, %c0_23] : memref<2x9x4x16x16xf32, #tpu.memory_space<vmem>>, vector<2x1x4x16x16xf32>
    %9 = vector.shape_cast %8 : vector<2x1x4x16x16xf32> to vector<2x4x16x16xf32>
    %10 = vector.shape_cast %7 : vector<2x4x16x16xf32> to vector<2x1x4x16x16xf32>
    tpu.vector_store %arg3[%c0_19, %c1_20, %c0_21, %c0_22, %c0_23], %10 {strides = array<i32>} : memref<2x9x4x16x16xf32, #tpu.memory_space<vmem>>, vector<2x1x4x16x16xf32>,
    %c0_24 = arith.constant 0 : index
    %c0_25 = arith.constant 0 : index
    %c0_26 = arith.constant 0 : index
    %c1_27 = arith.constant 1 : index
    %11 = vector.load %arg4[%c0_24, %c0_25, %c0_26, %c1_27] : memref<2x4x18x18xf32, #tpu.memory_space<vmem>>, vector<2x4x16x16xf32>
    %c0_28 = arith.constant 0 : index
    %c2 = arith.constant 2 : index
    %c0_29 = arith.constant 0 : index
    %c0_30 = arith.constant 0 : index
    %c0_31 = arith.constant 0 : index
    %12 = vector.load %arg3[%c0_28, %c2, %c0_29, %c0_30, %c0_31] : memref<2x9x4x16x16xf32, #tpu.memory_space<vmem>>, vector<2x1x4x16x16xf32>
    %13 = vector.shape_cast %12 : vector<2x1x4x16x16xf32> to vector<2x4x16x16xf32>
    %14 = vector.shape_cast %11 : vector<2x4x16x16xf32> to vector<2x1x4x16x16xf32>
    tpu.vector_store %arg3[%c0_28, %c2, %c0_29, %c0_30, %c0_31], %14 {strides = array<i32>} : memref<2x9x4x16x16xf32, #tpu.memory_space<vmem>>, vector<2x1x4x16x16xf32>,
    %c0_32 = arith.constant 0 : index
    %c0_33 = arith.constant 0 : index
    %c0_34 = arith.constant 0 : index
    %c2_35 = arith.constant 2 : index
    %15 = vector.load %arg4[%c0_32, %c0_33, %c0_34, %c2_35] : memref<2x4x18x18xf32, #tpu.memory_space<vmem>>, vector<2x4x16x16xf32>
    %c0_36 = arith.constant 0 : index
    %c3 = arith.constant 3 : index
    %c0_37 = arith.constant 0 : index
    %c0_38 = arith.constant 0 : index
    %c0_39 = arith.constant 0 : index
    %16 = vector.load %arg3[%c0_36, %c3, %c0_37, %c0_38, %c0_39] : memref<2x9x4x16x16xf32, #tpu.memory_space<vmem>>, vector<2x1x4x16x16xf32>
    %17 = vector.shape_cast %16 : vector<2x1x4x16x16xf32> to vector<2x4x16x16xf32>
    %18 = vector.shape_cast %15 : vector<2x4x16x16xf32> to vector<2x1x4x16x16xf32>
    tpu.vector_store %arg3[%c0_36, %c3, %c0_37, %c0_38, %c0_39], %18 {strides = array<i32>} : memref<2x9x4x16x16xf32, #tpu.memory_space<vmem>>, vector<2x1x4x16x16xf32>,
    %c0_40 = arith.constant 0 : index
    %c0_41 = arith.constant 0 : index
    %c1_42 = arith.constant 1 : index
    %c0_43 = arith.constant 0 : index
    %19 = vector.load %arg4[%c0_40, %c0_41, %c1_42, %c0_43] : memref<2x4x18x18xf32, #tpu.memory_space<vmem>>, vector<2x4x16x16xf32>
    %c0_44 = arith.constant 0 : index
    %c4 = arith.constant 4 : index
    %c0_45 = arith.constant 0 : index
    %c0_46 = arith.constant 0 : index
    %c0_47 = arith.constant 0 : index
    %20 = vector.load %arg3[%c0_44, %c4, %c0_45, %c0_46, %c0_47] : memref<2x9x4x16x16xf32, #tpu.memory_space<vmem>>, vector<2x1x4x16x16xf32>
    %21 = vector.shape_cast %20 : vector<2x1x4x16x16xf32> to vector<2x4x16x16xf32>
    %22 = vector.shape_cast %19 : vector<2x4x16x16xf32> to vector<2x1x4x16x16xf32>
    tpu.vector_store %arg3[%c0_44, %c4, %c0_45, %c0_46, %c0_47], %22 {strides = array<i32>} : memref<2x9x4x16x16xf32, #tpu.memory_space<vmem>>, vector<2x1x4x16x16xf32>,
    %c0_48 = arith.constant 0 : index
    %c0_49 = arith.constant 0 : index
    %c1_50 = arith.constant 1 : index
    %c2_51 = arith.constant 2 : index
    %23 = vector.load %arg4[%c0_48, %c0_49, %c1_50, %c2_51] : memref<2x4x18x18xf32, #tpu.memory_space<vmem>>, vector<2x4x16x16xf32>
    %c0_52 = arith.constant 0 : index
    %c5 = arith.constant 5 : index
    %c0_53 = arith.constant 0 : index
    %c0_54 = arith.constant 0 : index
    %c0_55 = arith.constant 0 : index
    %24 = vector.load %arg3[%c0_52, %c5, %c0_53, %c0_54, %c0_55] : memref<2x9x4x16x16xf32, #tpu.memory_space<vmem>>, vector<2x1x4x16x16xf32>
    %25 = vector.shape_cast %24 : vector<2x1x4x16x16xf32> to vector<2x4x16x16xf32>
    %26 = vector.shape_cast %23 : vector<2x4x16x16xf32> to vector<2x1x4x16x16xf32>
    tpu.vector_store %arg3[%c0_52, %c5, %c0_53, %c0_54, %c0_55], %26 {strides = array<i32>} : memref<2x9x4x16x16xf32, #tpu.memory_space<vmem>>, vector<2x1x4x16x16xf32>,
    %c0_56 = arith.constant 0 : index
    %c0_57 = arith.constant 0 : index
    %c2_58 = arith.constant 2 : index
    %c0_59 = arith.constant 0 : index
    %27 = vector.load %arg4[%c0_56, %c0_57, %c2_58, %c0_59] : memref<2x4x18x18xf32, #tpu.memory_space<vmem>>, vector<2x4x16x16xf32>
    %c0_60 = arith.constant 0 : index
    %c6 = arith.constant 6 : index
    %c0_61 = arith.constant 0 : index
    %c0_62 = arith.constant 0 : index
    %c0_63 = arith.constant 0 : index
    %28 = vector.load %arg3[%c0_60, %c6, %c0_61, %c0_62, %c0_63] : memref<2x9x4x16x16xf32, #tpu.memory_space<vmem>>, vector<2x1x4x16x16xf32>
    %29 = vector.shape_cast %28 : vector<2x1x4x16x16xf32> to vector<2x4x16x16xf32>
    %30 = vector.shape_cast %27 : vector<2x4x16x16xf32> to vector<2x1x4x16x16xf32>
    tpu.vector_store %arg3[%c0_60, %c6, %c0_61, %c0_62, %c0_63], %30 {strides = array<i32>} : memref<2x9x4x16x16xf32, #tpu.memory_space<vmem>>, vector<2x1x4x16x16xf32>,
    %c0_64 = arith.constant 0 : index
    %c0_65 = arith.constant 0 : index
    %c2_66 = arith.constant 2 : index
    %c1_67 = arith.constant 1 : index
    %31 = vector.load %arg4[%c0_64, %c0_65, %c2_66, %c1_67] : memref<2x4x18x18xf32, #tpu.memory_space<vmem>>, vector<2x4x16x16xf32>
    %c0_68 = arith.constant 0 : index
    %c7 = arith.constant 7 : index
    %c0_69 = arith.constant 0 : index
    %c0_70 = arith.constant 0 : index
    %c0_71 = arith.constant 0 : index
    %32 = vector.load %arg3[%c0_68, %c7, %c0_69, %c0_70, %c0_71] : memref<2x9x4x16x16xf32, #tpu.memory_space<vmem>>, vector<2x1x4x16x16xf32>
    %33 = vector.shape_cast %32 : vector<2x1x4x16x16xf32> to vector<2x4x16x16xf32>
    %34 = vector.shape_cast %31 : vector<2x4x16x16xf32> to vector<2x1x4x16x16xf32>
    tpu.vector_store %arg3[%c0_68, %c7, %c0_69, %c0_70, %c0_71], %34 {strides = array<i32>} : memref<2x9x4x16x16xf32, #tpu.memory_space<vmem>>, vector<2x1x4x16x16xf32>,
    %c0_72 = arith.constant 0 : index
    %c0_73 = arith.constant 0 : index
    %c2_74 = arith.constant 2 : index
    %c2_75 = arith.constant 2 : index
    %35 = vector.load %arg4[%c0_72, %c0_73, %c2_74, %c2_75] : memref<2x4x18x18xf32, #tpu.memory_space<vmem>>, vector<2x4x16x16xf32>
    %c0_76 = arith.constant 0 : index
    %c8 = arith.constant 8 : index
    %c0_77 = arith.constant 0 : index
    %c0_78 = arith.constant 0 : index
    %c0_79 = arith.constant 0 : index
    %36 = vector.load %arg3[%c0_76, %c8, %c0_77, %c0_78, %c0_79] : memref<2x9x4x16x16xf32, #tpu.memory_space<vmem>>, vector<2x1x4x16x16xf32>
    %37 = vector.shape_cast %36 : vector<2x1x4x16x16xf32> to vector<2x4x16x16xf32>
    %38 = vector.shape_cast %35 : vector<2x4x16x16xf32> to vector<2x1x4x16x16xf32>
    tpu.vector_store %arg3[%c0_76, %c8, %c0_77, %c0_78, %c0_79], %38 {strides = array<i32>} : memref<2x9x4x16x16xf32, #tpu.memory_space<vmem>>, vector<2x1x4x16x16xf32>,
    return
  }
  func.func @transform_0(%arg0: i32, %arg1: i32) -> (i32, i32, i32, i32) {
    %c0_i32 = arith.constant 0 : i32
    %c0_i32_0 = arith.constant 0 : i32
    %c0_i32_1 = arith.constant 0 : i32
    return %arg0, %arg1, %c0_i32, %c0_i32_0 : i32, i32, i32, i32
  }
  func.func @transform_1(%arg0: i32, %arg1: i32) -> (i32, i32, i32, i32, i32) {
    %c0_i32 = arith.constant 0 : i32
    %c0_i32_0 = arith.constant 0 : i32
    %c0_i32_1 = arith.constant 0 : i32
    %c0_i32_2 = arith.constant 0 : i32
    return %arg0, %c0_i32, %arg1, %c0_i32_0, %c0_i32_1 : i32, i32, i32, i32, i32
  }
}

</mosaic_0001>

<bundles_post_ra>
// kernel: tpu_custom_call.1
= control target key start
LH: loop header
LB: loop body
LE: loop exit
PB: predicated region body
PF: predicated region fallthrough
CT: control target
= control target key end

     0   :  { %6 = vsyncpa [#allocation4], 0  ;;  %s1296_s0 = inlined_call_operand.hbm [shape: f32[2,4,16,16], index: 0, kind: input, shape index: {}]   ;;  %s1297_s1 = inlined_call_operand.hbm [shape: f32[2,9,4,16,16], index: 1, kind: output, shape index: {}]  }
   0x1   :  { %7 = vsyncpa [#allocation5], 0  ;;  %s816_s6 = smov [#allocation3]  }
   0x2   :  { %s13_s7 = sshll.u32 %s816_s6, 4  ;;  %s14_s7 = int_to_ptr.vmem [resolvable:$true] %s13_s7 }
   0x3   :  { %s780_s8 = scalar_lea.vmem %s14_s7, 2048  ;;  %p785_p1 = scmp.lt.s32.totalorder %s14_s7, %s14_s7 }
   0x4   :  { %p781_p0 = scmp.ne.s32.totalorder %s14_s7, %s780_s8  ;;  %p786_p2 = scmp.lt.s32.totalorder %s780_s8, %s780_s8 }
   0x6   :  { %p787_p3 = por %p786_p2, %p785_p1 }
   0x8   :  { %p788_p4 = pnand %p787_p3, %p781_p0 }
   0xa   :  { %791 = shalt.err (!%p788_p4)
}
   0xb   :  { %s817_s9 = smov 128   ;;  %s818_s10 = smov 8  }
   0xc   :  { %19 = dma.hbm_to_vmem [thread:$0]  %s1296_s0, 2048, %s14_s7, [#allocation4], %s817_s9, %s817_s9, %s818_s10  }
   0xd   :  { %812 = dma.done.wait [#allocation4], 2048  }
   0xe   :  { %813 = vsyncadd [#allocation4], 4294965248  ;;  %vm39_vm0 = vcmask 146432   ;;  %v819_v0 = vmov 0.0   ;;  %vm42_vm1 = vcmask 140288   ;;  %v25_v1 = vld [vmem:[#allocation3 + $0x10] sm:$0xff] }
   0xf   :  { %44 = vst.msk [vmem:[#allocation2 + $0x18] sm:$0xff] %vm39_vm0, %v819_v0  ;;  %45 = vst.msk [vmem:[#allocation2 + $0x20] sm:$0xff] %vm39_vm0, %v819_v0  ;;  %vm146_vm2 = vcmask 130048   ;;  %v23_v2 = vld [vmem:[#allocation3] sm:$0xff]  ;;  %v26_v3 = vld [vmem:[#allocation3 + $0x18] sm:$0xff]  ;;  %s820_s0 = smov 1  }
  0x10   :  { %40 = vst.msk [vmem:[#allocation2] sm:$0xff] %vm39_vm0, %v819_v0  ;;  %41 = vst.msk [vmem:[#allocation2 + $0x8] sm:$0xff] %vm39_vm0, %v819_v0  ;;  %85 = vrot.lane.b32.xlu1 %v25_v1, %s820_s0  ;;  %81 = vrot.lane.b32.xlu0 %v23_v2, %s820_s0  ;;  %v24_v4 = vld [vmem:[#allocation3 + $0x8] sm:$0xff]  ;;  %v27_v5 = vld [vmem:[#allocation3 + $0x20] sm:$0xff]  ;;  %vm129_vm3 = vcmask 138248   ;;  %s821_s13 = smov 127  }
  0x11   :  { %47 = vst.msk [vmem:[#allocation2 + $0x30] sm:$0xff] %vm39_vm0, %v819_v0  ;;  %48 = vst.msk [vmem:[#allocation2 + $0x38] sm:$0xff] %vm39_vm0, %v819_v0  ;;  %v28_v6 = vld [vmem:[#allocation3 + $0x28] sm:$0xff]  ;;  %v29_v7 = vld [vmem:[#allocation3 + $0x30] sm:$0xff]  ;;  %s822_s14 = smov 126   ;;  %s823_s15 = smov [#allocation6]  }
  0x12   :  { %50 = vst.msk [vmem:[#allocation2 + $0x48] sm:$0xff] %vm39_vm0, %v819_v0  ;;  %51 = vst.msk [vmem:[#allocation2 + $0x50] sm:$0xff] %vm39_vm0, %v819_v0  ;;  %v30_v8 = vld [vmem:[#allocation3 + $0x38] sm:$0xff]  ;;  %v31_v9 = vld [vmem:[#allocation3 + $0x40] sm:$0xff]  ;;  %s752_s16 = sshll.u32 %s823_s15, 4  ;;  %s753_s16 = int_to_ptr.vmem [resolvable:$true] %s752_s16 }
  0x13   :  { %53 = vst.msk [vmem:[#allocation2 + $0x60] sm:$0xff] %vm39_vm0, %v819_v0  ;;  %54 = vst.msk [vmem:[#allocation2 + $0x68] sm:$0xff] %vm39_vm0, %v819_v0  ;;  %v32_v10 = vld [vmem:[#allocation3 + $0x48] sm:$0xff]  ;;  %v33_v11 = vld [vmem:[#allocation3 + $0x50] sm:$0xff]  ;;  %s792_s17 = scalar_lea.vmem %s753_s16, 18432  ;;  %p797_p6 = scmp.lt.s32.totalorder %s753_s16, %s753_s16 }
  0x14   :  { %56 = vst.msk [vmem:[#allocation2 + $0x78] sm:$0xff] %vm39_vm0, %v819_v0  ;;  %57 = vst.msk [vmem:[#allocation2 + $0x80] sm:$0xff] %vm39_vm0, %v819_v0  ;;  %v34_v12 = vld [vmem:[#allocation3 + $0x58] sm:$0xff]  ;;  %v35_v13 = vld [vmem:[#allocation3 + $0x60] sm:$0xff]  ;;  %87 = vrot.lane.b32.xlu1 %v26_v3, %s820_s0  ;;  %83 = vrot.lane.b32.xlu0 %v24_v4, %s820_s0  ;;  %p793_p5 = scmp.ne.s32.totalorder %s753_s16, %s792_s17  ;;  %p798_p7 = scmp.lt.s32.totalorder %s792_s17, %s792_s17 }
  0x15   :  { %59 = vst.msk [vmem:[#allocation2 + $0x90] sm:$0xff] %vm39_vm0, %v819_v0  ;;  %60 = vst.msk [vmem:[#allocation2 + $0x98] sm:$0xff] %vm39_vm0, %v819_v0  ;;  %v36_v14 = vld [vmem:[#allocation3 + $0x68] sm:$0xff]  ;;  %v37_v15 = vld [vmem:[#allocation3 + $0x70] sm:$0xff] }
  0x16   :  { %62 = vst.msk [vmem:[#allocation2 + $0xa8] sm:$0xff] %vm39_vm0, %v819_v0  ;;  %63 = vst.msk [vmem:[#allocation2 + $0xb0] sm:$0xff] %vm39_vm0, %v819_v0  ;;  %v38_v16 = vld [vmem:[#allocation3 + $0x78] sm:$0xff]  ;;  %p799_p8 = por %p798_p7, %p797_p6 }
  0x17   :  { %46 = vst.msk [vmem:[#allocation2 + $0x28] sm:$0x3] %vm42_vm1, %v819_v0  ;;  %43 = vst.msk [vmem:[#allocation2 + $0x10] sm:$0x3] %vm42_vm1, %v819_v0 }
  0x18   :  { %49 = vst.msk [vmem:[#allocation2 + $0x40] sm:$0x3] %vm42_vm1, %v819_v0  ;;  %52 = vst.msk [vmem:[#allocation2 + $0x58] sm:$0x3] %vm42_vm1, %v819_v0  ;;  %89 = vrot.lane.b32.xlu0 %v27_v5, %s820_s0  ;;  %91 = vrot.lane.b32.xlu1 %v28_v6, %s820_s0  ;;  %p800_p9 = pnand %p799_p8, %p793_p5 }
  0x19   :  { %55 = vst.msk [vmem:[#allocation2 + $0x70] sm:$0x3] %vm42_vm1, %v819_v0  ;;  %58 = vst.msk [vmem:[#allocation2 + $0x88] sm:$0x3] %vm42_vm1, %v819_v0 }
  0x1a   :  { %61 = vst.msk [vmem:[#allocation2 + $0xa0] sm:$0x3] %vm42_vm1, %v819_v0  ;;  %64 = vst.msk [vmem:[#allocation2 + $0xb8] sm:$0x3] %vm42_vm1, %v819_v0 }
  0x1b   :  { %149 = vst.msk [vmem:[#allocation6 + $0x10] sm:$0xff] %vm146_vm2, %v25_v1  ;;  %147 = vst.msk [vmem:[#allocation6] sm:$0xff] %vm146_vm2, %v23_v2 }
  0x1c   :  { %150 = vst.msk [vmem:[#allocation6 + $0x18] sm:$0xff] %vm146_vm2, %v26_v3  ;;  %148 = vst.msk [vmem:[#allocation6 + $0x8] sm:$0xff] %vm146_vm2, %v24_v4  ;;  %93 = vrot.lane.b32.xlu0 %v29_v7, %s820_s0  ;;  %95 = vrot.lane.b32.xlu1 %v30_v8, %s820_s0 }
  0x1d   :  { %151 = vst.msk [vmem:[#allocation6 + $0x20] sm:$0xff] %vm146_vm2, %v27_v5  ;;  %152 = vst.msk [vmem:[#allocation6 + $0x28] sm:$0xff] %vm146_vm2, %v28_v6 }
  0x1e   :  { %153 = vst.msk [vmem:[#allocation6 + $0x30] sm:$0xff] %vm146_vm2, %v29_v7  ;;  %154 = vst.msk [vmem:[#allocation6 + $0x38] sm:$0xff] %vm146_vm2, %v30_v8 }
  0x1f   :  { %155 = vst.msk [vmem:[#allocation6 + $0x240] sm:$0xff] %vm146_vm2, %v31_v9  ;;  %156 = vst.msk [vmem:[#allocation6 + $0x248] sm:$0xff] %vm146_vm2, %v32_v10 }
  0x20   :  { %157 = vst.msk [vmem:[#allocation6 + $0x250] sm:$0xff] %vm146_vm2, %v33_v11  ;;  %158 = vst.msk [vmem:[#allocation6 + $0x258] sm:$0xff] %vm146_vm2, %v34_v12  ;;  %97 = vrot.lane.b32.xlu0 %v31_v9, %s820_s0  ;;  %99 = vrot.lane.b32.xlu1 %v32_v10, %s820_s0 }
  0x21   :  { %159 = vst.msk [vmem:[#allocation6 + $0x260] sm:$0xff] %vm146_vm2, %v35_v13  ;;  %160 = vst.msk [vmem:[#allocation6 + $0x268] sm:$0xff] %vm146_vm2, %v36_v14 }
  0x22   :  { %161 = vst.msk [vmem:[#allocation6 + $0x270] sm:$0xff] %vm146_vm2, %v37_v15  ;;  %162 = vst.msk [vmem:[#allocation6 + $0x278] sm:$0xff] %vm146_vm2, %v38_v16 }
  0x24   :  { %101 = vrot.lane.b32.xlu0 %v33_v11, %s820_s0  ;;  %103 = vrot.lane.b32.xlu1 %v34_v12, %s820_s0 }
  0x28   :  { %105 = vrot.lane.b32.xlu0 %v35_v13, %s820_s0  ;;  %107 = vrot.lane.b32.xlu1 %v36_v14, %s820_s0 }
  0x2c   :  { %109 = vrot.lane.b32.xlu0 %v37_v15, %s820_s0  ;;  %111 = vrot.lane.b32.xlu1 %v38_v16, %s820_s0 }
  0x82   :  { %v86_v17 = vpop.permute.xlu1 %85  ;;  %v82_v18 = vpop.permute.xlu0 %81 }
  0x83   :  { %132 = vst.msk [vmem:[#allocation2 + $0x19] sm:$0xff] %vm129_vm3, %v86_v17  ;;  %130 = vst.msk [vmem:[#allocation2 + $0x1] sm:$0xff] %vm129_vm3, %v82_v18 }
  0x86   :  { %v88_v19 = vpop.permute.xlu1 %87  ;;  %v84_v20 = vpop.permute.xlu0 %83 }
  0x87   :  { %133 = vst.msk [vmem:[#allocation2 + $0x21] sm:$0xff] %vm129_vm3, %v88_v19  ;;  %131 = vst.msk [vmem:[#allocation2 + $0x9] sm:$0xff] %vm129_vm3, %v84_v20 }
  0x8a   :  { %v892_v21 = vld [vmem:[#allocation2 + $0x18] sm:$0xff]  ;;  %v896_v23 = vld [vmem:[#allocation2] sm:$0xff]  ;;  %v90_v24 = vpop.permute.xlu0 %89  ;;  %v92_v25 = vpop.permute.xlu1 %91 }
  0x8b   :  { %v894_v22 = vld [vmem:[#allocation2 + $0x19] sm:$0xff]  ;;  %182 = vst.msk [vmem:[#allocation6 + $0x50] sm:$0xff] %vm146_vm2, %v892_v21  ;;  %180 = vst.msk [vmem:[#allocation6 + $0x40] sm:$0xff] %vm146_vm2, %v896_v23  ;;  %v904_v26 = vld [vmem:[#allocation2 + $0x1] sm:$0xff]  ;;  %228 = vrot.lane.b32.xlu0 %v896_v23, %s821_s13 }
  0x8c   :  { %409 = vst.msk [vmem:[#allocation6 + $0x110] sm:$0xff] %vm146_vm2, %v894_v22  ;;  %407 = vst.msk [vmem:[#allocation6 + $0x100] sm:$0xff] %vm146_vm2, %v904_v26 }
  0x8d   :  { %134 = vst.msk [vmem:[#allocation2 + $0x31] sm:$0xff] %vm129_vm3, %v90_v24  ;;  %135 = vst.msk [vmem:[#allocation2 + $0x39] sm:$0xff] %vm129_vm3, %v92_v25 }
  0x8e   :  { %v912_v27 = vld [vmem:[#allocation2 + $0x20] sm:$0xff]  ;;  %v94_v30 = vpop.permute.xlu0 %93  ;;  %v96_v31 = vpop.permute.xlu1 %95  ;;  %v926_v33 = vld [vmem:[#allocation2 + $0x8] sm:$0xff] }
  0x8f   :  { %v914_v28 = vld [vmem:[#allocation2 + $0x21] sm:$0xff]  ;;  %183 = vst.msk [vmem:[#allocation6 + $0x58] sm:$0xff] %vm146_vm2, %v912_v27  ;;  %v928_v34 = vld [vmem:[#allocation2 + $0x9] sm:$0xff]  ;;  %232 = vrot.lane.b32.xlu0 %v892_v21, %s821_s13  ;;  %181 = vst.msk [vmem:[#allocation6 + $0x48] sm:$0xff] %vm146_vm2, %v926_v33  ;;  %230 = vrot.lane.b32.xlu1 %v926_v33, %s821_s13 }
  0x90   :  { %v916_v29 = vld [vmem:[#allocation2 + $0x1a] sm:$0xff]  ;;  %410 = vst.msk [vmem:[#allocation6 + $0x118] sm:$0xff] %vm146_vm2, %v914_v28  ;;  %v922_v32 = vld [vmem:[#allocation2 + $0x22] sm:$0xff]  ;;  %408 = vst.msk [vmem:[#allocation6 + $0x108] sm:$0xff] %vm146_vm2, %v928_v34 }
  0x91   :  { %539 = vst.msk [vmem:[#allocation6 + $0x190] sm:$0xff] %vm146_vm2, %v916_v29  ;;  %540 = vst.msk [vmem:[#allocation6 + $0x198] sm:$0xff] %vm146_vm2, %v922_v32  ;;  %v940_v35 = vld [vmem:[#allocation2 + $0x2] sm:$0xff]  ;;  %v942_v36 = vld [vmem:[#allocation2 + $0xa] sm:$0xff] }
  0x92   :  { %136 = vst.msk [vmem:[#allocation2 + $0x49] sm:$0xff] %vm129_vm3, %v94_v30  ;;  %137 = vst.msk [vmem:[#allocation2 + $0x51] sm:$0xff] %vm129_vm3, %v96_v31  ;;  %v98_v40 = vpop.permute.xlu0 %97  ;;  %v100_v41 = vpop.permute.xlu1 %99 }
  0x93   :  { %537 = vst.msk [vmem:[#allocation6 + $0x180] sm:$0xff] %vm146_vm2, %v940_v35  ;;  %538 = vst.msk [vmem:[#allocation6 + $0x188] sm:$0xff] %vm146_vm2, %v942_v36  ;;  %234 = vrot.lane.b32.xlu1 %v912_v27, %s821_s13 }
  0x94   :  { %v950_v37 = vld [vmem:[#allocation2 + $0x30] sm:$0xff]  ;;  %v954_v39 = vld [vmem:[#allocation2 + $0x38] sm:$0xff]  ;;  %138 = vst.msk [vmem:[#allocation2 + $0x61] sm:$0xff] %vm129_vm3, %v98_v40  ;;  %139 = vst.msk [vmem:[#allocation2 + $0x69] sm:$0xff] %vm129_vm3, %v100_v41 }
  0x95   :  { %v952_v38 = vld [vmem:[#allocation2 + $0x31] sm:$0xff]  ;;  %184 = vst.msk [vmem:[#allocation6 + $0x60] sm:$0xff] %vm146_vm2, %v950_v37  ;;  %185 = vst.msk [vmem:[#allocation6 + $0x68] sm:$0xff] %vm146_vm2, %v954_v39  ;;  %v962_v42 = vld [vmem:[#allocation2 + $0x39] sm:$0xff]  ;;  %236 = vrot.lane.b32.xlu0 %v950_v37, %s821_s13 }
  0x96   :  { %411 = vst.msk [vmem:[#allocation6 + $0x120] sm:$0xff] %vm146_vm2, %v952_v38  ;;  %v964_v43 = vld [vmem:[#allocation2 + $0x32] sm:$0xff]  ;;  %v966_v44 = vld [vmem:[#allocation2 + $0x3a] sm:$0xff]  ;;  %412 = vst.msk [vmem:[#allocation6 + $0x128] sm:$0xff] %vm146_vm2, %v962_v42  ;;  %v102_v48 = vpop.permute.xlu0 %101  ;;  %v104_v49 = vpop.permute.xlu1 %103 }
  0x97   :  { %541 = vst.msk [vmem:[#allocation6 + $0x1a0] sm:$0xff] %vm146_vm2, %v964_v43  ;;  %542 = vst.msk [vmem:[#allocation6 + $0x1a8] sm:$0xff] %vm146_vm2, %v966_v44  ;;  %238 = vrot.lane.b32.xlu1 %v954_v39, %s821_s13 }
  0x98   :  { %140 = vst.msk [vmem:[#allocation2 + $0x79] sm:$0xff] %vm129_vm3, %v102_v48  ;;  %141 = vst.msk [vmem:[#allocation2 + $0x81] sm:$0xff] %vm129_vm3, %v104_v49 }
  0x99   :  { %v980_v45 = vld [vmem:[#allocation2 + $0x48] sm:$0xff]  ;;  %v984_v47 = vld [vmem:[#allocation2 + $0x50] sm:$0xff] }
  0x9a   :  { %v982_v46 = vld [vmem:[#allocation2 + $0x49] sm:$0xff]  ;;  %186 = vst.msk [vmem:[#allocation6 + $0x70] sm:$0xff] %vm146_vm2, %v980_v45  ;;  %187 = vst.msk [vmem:[#allocation6 + $0x78] sm:$0xff] %vm146_vm2, %v984_v47  ;;  %v992_v50 = vld [vmem:[#allocation2 + $0x51] sm:$0xff]  ;;  %240 = vrot.lane.b32.xlu0 %v980_v45, %s821_s13  ;;  %v106_v56 = vpop.permute.xlu0 %105  ;;  %v108_v57 = vpop.permute.xlu1 %107 }
  0x9b   :  { %413 = vst.msk [vmem:[#allocation6 + $0x130] sm:$0xff] %vm146_vm2, %v982_v46  ;;  %v994_v51 = vld [vmem:[#allocation2 + $0x4a] sm:$0xff]  ;;  %v996_v52 = vld [vmem:[#allocation2 + $0x52] sm:$0xff]  ;;  %414 = vst.msk [vmem:[#allocation6 + $0x138] sm:$0xff] %vm146_vm2, %v992_v50  ;;  %242 = vrot.lane.b32.xlu1 %v984_v47, %s821_s13 }
  0x9c   :  { %543 = vst.msk [vmem:[#allocation6 + $0x1b0] sm:$0xff] %vm146_vm2, %v994_v51  ;;  %544 = vst.msk [vmem:[#allocation6 + $0x1b8] sm:$0xff] %vm146_vm2, %v996_v52  ;;  %v1010_v53 = vld [vmem:[#allocation2 + $0x60] sm:$0xff]  ;;  %v1014_v55 = vld [vmem:[#allocation2 + $0x68] sm:$0xff] }
  0x9d   :  { %v1012_v54 = vld [vmem:[#allocation2 + $0x61] sm:$0xff]  ;;  %188 = vst.msk [vmem:[#allocation6 + $0x280] sm:$0xff] %vm146_vm2, %v1010_v53  ;;  %189 = vst.msk [vmem:[#allocation6 + $0x288] sm:$0xff] %vm146_vm2, %v1014_v55  ;;  %v1022_v58 = vld [vmem:[#allocation2 + $0x69] sm:$0xff] }
  0x9e   :  { %415 = vst.msk [vmem:[#allocation6 + $0x340] sm:$0xff] %vm146_vm2, %v1012_v54  ;;  %v1024_v59 = vld [vmem:[#allocation2 + $0x62] sm:$0xff]  ;;  %v1026_v60 = vld [vmem:[#allocation2 + $0x6a] sm:$0xff]  ;;  %244 = vrot.lane.b32.xlu0 %v1010_v53, %s821_s13  ;;  %416 = vst.msk [vmem:[#allocation6 + $0x348] sm:$0xff] %vm146_vm2, %v1022_v58  ;;  %v110_v0 = vpop.permute.xlu0 %109  ;;  %v112_v1 = vpop.permute.xlu1 %111 }
  0x9f   :  { %142 = vst.msk [vmem:[#allocation2 + $0x91] sm:$0xff] %vm129_vm3, %v106_v56  ;;  %143 = vst.msk [vmem:[#allocation2 + $0x99] sm:$0xff] %vm129_vm3, %v108_v57  ;;  %v173_v61 = vld [vmem:[#allocation2 + $0x78] sm:$0xff]  ;;  %v174_v63 = vld [vmem:[#allocation2 + $0x80] sm:$0xff]  ;;  %246 = vrot.lane.b32.xlu1 %v1014_v55, %s821_s13 }
  0xa0   :  { %545 = vst.msk [vmem:[#allocation6 + $0x3c0] sm:$0xff] %vm146_vm2, %v1024_v59  ;;  %546 = vst.msk [vmem:[#allocation6 + $0x3c8] sm:$0xff] %vm146_vm2, %v1026_v60  ;;  %v1040_v62 = vld [vmem:[#allocation2 + $0x79] sm:$0xff]  ;;  %v1046_v2 = vld [vmem:[#allocation2 + $0x81] sm:$0xff] }
  0xa1   :  { %190 = vst.msk [vmem:[#allocation6 + $0x290] sm:$0xff] %vm146_vm2, %v173_v61  ;;  %417 = vst.msk [vmem:[#allocation6 + $0x350] sm:$0xff] %vm146_vm2, %v1040_v62  ;;  %v1048_v3 = vld [vmem:[#allocation2 + $0x7a] sm:$0xff]  ;;  %v1050_v4 = vld [vmem:[#allocation2 + $0x82] sm:$0xff] }
  0xa2   :  { %191 = vst.msk [vmem:[#allocation6 + $0x298] sm:$0xff] %vm146_vm2, %v174_v63  ;;  %248 = vrot.lane.b32.xlu0 %v173_v61, %s821_s13  ;;  %418 = vst.msk [vmem:[#allocation6 + $0x358] sm:$0xff] %vm146_vm2, %v1046_v2 }
  0xa3   :  { %144 = vst.msk [vmem:[#allocation2 + $0xa9] sm:$0xff] %vm129_vm3, %v110_v0  ;;  %145 = vst.msk [vmem:[#allocation2 + $0xb1] sm:$0xff] %vm129_vm3, %v112_v1  ;;  %250 = vrot.lane.b32.xlu1 %v174_v63, %s821_s13 }
  0xa4   :  { %547 = vst.msk [vmem:[#allocation6 + $0x3d0] sm:$0xff] %vm146_vm2, %v1048_v3  ;;  %548 = vst.msk [vmem:[#allocation6 + $0x3d8] sm:$0xff] %vm146_vm2, %v1050_v4 }
  0xa6   :  { %v175_v5 = vld [vmem:[#allocation2 + $0x90] sm:$0xff]  ;;  %v176_v7 = vld [vmem:[#allocation2 + $0x98] sm:$0xff] }
  0xa7   :  { %v402_v6 = vld [vmem:[#allocation2 + $0x91] sm:$0xff]  ;;  %192 = vst.msk [vmem:[#allocation6 + $0x2a0] sm:$0xff] %vm146_vm2, %v175_v5  ;;  %193 = vst.msk [vmem:[#allocation6 + $0x2a8] sm:$0xff] %vm146_vm2, %v176_v7  ;;  %v403_v8 = vld [vmem:[#allocation2 + $0x99] sm:$0xff]  ;;  %252 = vrot.lane.b32.xlu0 %v175_v5, %s821_s13  ;;  %254 = vrot.lane.b32.xlu1 %v176_v7, %s821_s13 }
  0xa8   :  { %419 = vst.msk [vmem:[#allocation6 + $0x360] sm:$0xff] %vm146_vm2, %v402_v6  ;;  %v1066_v9 = vld [vmem:[#allocation2 + $0x92] sm:$0xff]  ;;  %v1068_v10 = vld [vmem:[#allocation2 + $0x9a] sm:$0xff]  ;;  %420 = vst.msk [vmem:[#allocation6 + $0x368] sm:$0xff] %vm146_vm2, %v403_v8 }
  0xa9   :  { %549 = vst.msk [vmem:[#allocation6 + $0x3e0] sm:$0xff] %vm146_vm2, %v1066_v9  ;;  %550 = vst.msk [vmem:[#allocation6 + $0x3e8] sm:$0xff] %vm146_vm2, %v1068_v10 }
  0xaa   :  { %v177_v11 = vld [vmem:[#allocation2 + $0xa8] sm:$0xff]  ;;  %v178_v13 = vld [vmem:[#allocation2 + $0xb0] sm:$0xff] }
  0xab   :  { %v404_v12 = vld [vmem:[#allocation2 + $0xa9] sm:$0xff]  ;;  %194 = vst.msk [vmem:[#allocation6 + $0x2b0] sm:$0xff] %vm146_vm2, %v177_v11  ;;  %195 = vst.msk [vmem:[#allocation6 + $0x2b8] sm:$0xff] %vm146_vm2, %v178_v13  ;;  %v405_v14 = vld [vmem:[#allocation2 + $0xb1] sm:$0xff]  ;;  %256 = vrot.lane.b32.xlu0 %v177_v11, %s821_s13  ;;  %258 = vrot.lane.b32.xlu1 %v178_v13, %s821_s13 }
  0xac   :  { %421 = vst.msk [vmem:[#allocation6 + $0x370] sm:$0xff] %vm146_vm2, %v404_v12  ;;  %v1080_v15 = vld [vmem:[#allocation2 + $0xaa] sm:$0xff]  ;;  %v1082_v16 = vld [vmem:[#allocation2 + $0xb2] sm:$0xff]  ;;  %422 = vst.msk [vmem:[#allocation6 + $0x378] sm:$0xff] %vm146_vm2, %v405_v14 }
  0xad   :  { %551 = vst.msk [vmem:[#allocation6 + $0x3f0] sm:$0xff] %vm146_vm2, %v1080_v15  ;;  %552 = vst.msk [vmem:[#allocation6 + $0x3f8] sm:$0xff] %vm146_vm2, %v1082_v16 }
  0xaf   :  { %325 = vrot.lane.b32.xlu0 %v896_v23, %s822_s14  ;;  %327 = vrot.lane.b32.xlu1 %v926_v33, %s822_s14 }
  0xb3   :  { %329 = vrot.lane.b32.xlu0 %v892_v21, %s822_s14  ;;  %331 = vrot.lane.b32.xlu1 %v912_v27, %s822_s14 }
  0xb7   :  { %333 = vrot.lane.b32.xlu0 %v950_v37, %s822_s14  ;;  %335 = vrot.lane.b32.xlu1 %v954_v39, %s822_s14 }
  0xbb   :  { %337 = vrot.lane.b32.xlu0 %v980_v45, %s822_s14  ;;  %339 = vrot.lane.b32.xlu1 %v984_v47, %s822_s14 }
  0xbf   :  { %341 = vrot.lane.b32.xlu0 %v1010_v53, %s822_s14  ;;  %343 = vrot.lane.b32.xlu1 %v1014_v55, %s822_s14 }
  0xc3   :  { %345 = vrot.lane.b32.xlu0 %v173_v61, %s822_s14  ;;  %347 = vrot.lane.b32.xlu1 %v174_v63, %s822_s14 }
  0xc7   :  { %349 = vrot.lane.b32.xlu0 %v175_v5, %s822_s14  ;;  %351 = vrot.lane.b32.xlu1 %v176_v7, %s822_s14 }
  0xcb   :  { %353 = vrot.lane.b32.xlu0 %v177_v11, %s822_s14  ;;  %355 = vrot.lane.b32.xlu1 %v178_v13, %s822_s14 }
  0xcf   :  { %455 = vrot.lane.b32.xlu0 %v904_v26, %s822_s14  ;;  %457 = vrot.lane.b32.xlu1 %v928_v34, %s822_s14 }
  0xd3   :  { %459 = vrot.lane.b32.xlu0 %v894_v22, %s822_s14  ;;  %461 = vrot.lane.b32.xlu1 %v914_v28, %s822_s14 }
  0xd7   :  { %463 = vrot.lane.b32.xlu0 %v952_v38, %s822_s14  ;;  %465 = vrot.lane.b32.xlu1 %v962_v42, %s822_s14 }
  0xdb   :  { %467 = vrot.lane.b32.xlu0 %v982_v46, %s822_s14  ;;  %469 = vrot.lane.b32.xlu1 %v992_v50, %s822_s14 }
  0xdf   :  { %471 = vrot.lane.b32.xlu0 %v1012_v54, %s822_s14  ;;  %473 = vrot.lane.b32.xlu1 %v1022_v58, %s822_s14 }
  0xe3   :  { %475 = vrot.lane.b32.xlu0 %v1040_v62, %s822_s14  ;;  %477 = vrot.lane.b32.xlu1 %v1046_v2, %s822_s14 }
  0xe7   :  { %479 = vrot.lane.b32.xlu0 %v402_v6, %s822_s14  ;;  %481 = vrot.lane.b32.xlu1 %v403_v8, %s822_s14 }
  0xeb   :  { %483 = vrot.lane.b32.xlu0 %v404_v12, %s822_s14  ;;  %485 = vrot.lane.b32.xlu1 %v405_v14, %s822_s14 }
  0xef   :  { %585 = vrot.lane.b32.xlu0 %v940_v35, %s821_s13  ;;  %587 = vrot.lane.b32.xlu1 %v942_v36, %s821_s13 }
  0xf3   :  { %589 = vrot.lane.b32.xlu0 %v916_v29, %s821_s13  ;;  %591 = vrot.lane.b32.xlu1 %v922_v32, %s821_s13 }
  0xf7   :  { %593 = vrot.lane.b32.xlu0 %v964_v43, %s821_s13  ;;  %595 = vrot.lane.b32.xlu1 %v966_v44, %s821_s13 }
  0xfb   :  { %597 = vrot.lane.b32.xlu0 %v994_v51, %s821_s13  ;;  %599 = vrot.lane.b32.xlu1 %v996_v52, %s821_s13 }
  0xfd   :  { %v229_v17 = vpop.permute.xlu0 %228 }
  0xfe   :  { %277 = vst.msk [vmem:[#allocation6 + $0x80] sm:$0xff] %vm146_vm2, %v229_v17 }
  0xff   :  { %601 = vrot.lane.b32.xlu0 %v1024_v59, %s821_s13  ;;  %603 = vrot.lane.b32.xlu1 %v1026_v60, %s821_s13 }
 0x101   :  { %v233_v18 = vpop.permute.xlu0 %232  ;;  %v231_v19 = vpop.permute.xlu1 %230 }
 0x102   :  { %279 = vst.msk [vmem:[#allocation6 + $0x90] sm:$0xff] %vm146_vm2, %v233_v18  ;;  %278 = vst.msk [vmem:[#allocation6 + $0x88] sm:$0xff] %vm146_vm2, %v231_v19 }
 0x103   :  { %605 = vrot.lane.b32.xlu0 %v1048_v3, %s821_s13  ;;  %607 = vrot.lane.b32.xlu1 %v1050_v4, %s821_s13 }
 0x105   :  { %v235_v21 = vpop.permute.xlu1 %234 }
 0x106   :  { %280 = vst.msk [vmem:[#allocation6 + $0x98] sm:$0xff] %vm146_vm2, %v235_v21 }
 0x107   :  { %609 = vrot.lane.b32.xlu0 %v1066_v9, %s821_s13  ;;  %v237_v20 = vpop.permute.xlu0 %236  ;;  %611 = vrot.lane.b32.xlu1 %v1068_v10, %s821_s13 }
 0x108   :  { %281 = vst.msk [vmem:[#allocation6 + $0xa0] sm:$0xff] %vm146_vm2, %v237_v20 }
 0x109   :  { %v239_v23 = vpop.permute.xlu1 %238 }
 0x10a   :  { %282 = vst.msk [vmem:[#allocation6 + $0xa8] sm:$0xff] %vm146_vm2, %v239_v23 }
 0x10b   :  { %613 = vrot.lane.b32.xlu0 %v1080_v15, %s821_s13  ;;  %615 = vrot.lane.b32.xlu1 %v1082_v16, %s821_s13 }
 0x10c   :  { %v241_v22 = vpop.permute.xlu0 %240 }
 0x10d   :  { %283 = vst.msk [vmem:[#allocation6 + $0xb0] sm:$0xff] %vm146_vm2, %v241_v22  ;;  %v243_v25 = vpop.permute.xlu1 %242 }
 0x10e   :  { %284 = vst.msk [vmem:[#allocation6 + $0xb8] sm:$0xff] %vm146_vm2, %v243_v25 }
 0x10f   :  { %682 = vrot.lane.b32.xlu0 %v940_v35, %s822_s14  ;;  %684 = vrot.lane.b32.xlu1 %v942_v36, %s822_s14 }
 0x110   :  { %v245_v24 = vpop.permute.xlu0 %244 }
 0x111   :  { %285 = vst.msk [vmem:[#allocation6 + $0x2c0] sm:$0xff] %vm146_vm2, %v245_v24  ;;  %v247_v27 = vpop.permute.xlu1 %246 }
 0x112   :  { %286 = vst.msk [vmem:[#allocation6 + $0x2c8] sm:$0xff] %vm146_vm2, %v247_v27 }
 0x113   :  { %686 = vrot.lane.b32.xlu0 %v916_v29, %s822_s14  ;;  %688 = vrot.lane.b32.xlu1 %v922_v32, %s822_s14 }
 0x114   :  { %v249_v26 = vpop.permute.xlu0 %248 }
 0x115   :  { %287 = vst.msk [vmem:[#allocation6 + $0x2d0] sm:$0xff] %vm146_vm2, %v249_v26  ;;  %v251_v30 = vpop.permute.xlu1 %250 }
 0x116   :  { %288 = vst.msk [vmem:[#allocation6 + $0x2d8] sm:$0xff] %vm146_vm2, %v251_v30 }
 0x117   :  { %690 = vrot.lane.b32.xlu0 %v964_v43, %s822_s14  ;;  %692 = vrot.lane.b32.xlu1 %v966_v44, %s822_s14 }
 0x119   :  { %v253_v28 = vpop.permute.xlu0 %252  ;;  %v255_v31 = vpop.permute.xlu1 %254 }
 0x11a   :  { %289 = vst.msk [vmem:[#allocation6 + $0x2e0] sm:$0xff] %vm146_vm2, %v253_v28  ;;  %290 = vst.msk [vmem:[#allocation6 + $0x2e8] sm:$0xff] %vm146_vm2, %v255_v31 }
 0x11b   :  { %694 = vrot.lane.b32.xlu0 %v994_v51, %s822_s14  ;;  %696 = vrot.lane.b32.xlu1 %v996_v52, %s822_s14 }
 0x11d   :  { %v257_v29 = vpop.permute.xlu0 %256  ;;  %v259_v33 = vpop.permute.xlu1 %258 }
 0x11e   :  { %291 = vst.msk [vmem:[#allocation6 + $0x2f0] sm:$0xff] %vm146_vm2, %v257_v29  ;;  %292 = vst.msk [vmem:[#allocation6 + $0x2f8] sm:$0xff] %vm146_vm2, %v259_v33 }
 0x11f   :  { %698 = vrot.lane.b32.xlu0 %v1024_v59, %s822_s14  ;;  %700 = vrot.lane.b32.xlu1 %v1026_v60, %s822_s14 }
 0x121   :  { %v326_v32 = vpop.permute.xlu0 %325  ;;  %v328_v35 = vpop.permute.xlu1 %327 }
 0x122   :  { %374 = vst.msk [vmem:[#allocation6 + $0xc0] sm:$0xff] %vm146_vm2, %v326_v32  ;;  %375 = vst.msk [vmem:[#allocation6 + $0xc8] sm:$0xff] %vm146_vm2, %v328_v35 }
 0x123   :  { %702 = vrot.lane.b32.xlu0 %v1048_v3, %s822_s14  ;;  %704 = vrot.lane.b32.xlu1 %v1050_v4, %s822_s14 }
 0x125   :  { %v330_v34 = vpop.permute.xlu0 %329  ;;  %v332_v37 = vpop.permute.xlu1 %331 }
 0x126   :  { %376 = vst.msk [vmem:[#allocation6 + $0xd0] sm:$0xff] %vm146_vm2, %v330_v34  ;;  %377 = vst.msk [vmem:[#allocation6 + $0xd8] sm:$0xff] %vm146_vm2, %v332_v37 }
 0x127   :  { %706 = vrot.lane.b32.xlu0 %v1066_v9, %s822_s14  ;;  %708 = vrot.lane.b32.xlu1 %v1068_v10, %s822_s14 }
 0x129   :  { %v334_v36 = vpop.permute.xlu0 %333  ;;  %v336_v39 = vpop.permute.xlu1 %335 }
 0x12a   :  { %378 = vst.msk [vmem:[#allocation6 + $0xe0] sm:$0xff] %vm146_vm2, %v334_v36  ;;  %379 = vst.msk [vmem:[#allocation6 + $0xe8] sm:$0xff] %vm146_vm2, %v336_v39 }
 0x12b   :  { %710 = vrot.lane.b32.xlu0 %v1080_v15, %s822_s14  ;;  %712 = vrot.lane.b32.xlu1 %v1082_v16, %s822_s14 }
 0x12d   :  { %v338_v38 = vpop.permute.xlu0 %337  ;;  %v340_v41 = vpop.permute.xlu1 %339 }
 0x12e   :  { %380 = vst.msk [vmem:[#allocation6 + $0xf0] sm:$0xff] %vm146_vm2, %v338_v38  ;;  %381 = vst.msk [vmem:[#allocation6 + $0xf8] sm:$0xff] %vm146_vm2, %v340_v41 }
 0x131   :  { %v342_v40 = vpop.permute.xlu0 %341  ;;  %v344_v43 = vpop.permute.xlu1 %343 }
 0x132   :  { %382 = vst.msk [vmem:[#allocation6 + $0x300] sm:$0xff] %vm146_vm2, %v342_v40  ;;  %383 = vst.msk [vmem:[#allocation6 + $0x308] sm:$0xff] %vm146_vm2, %v344_v43 }
 0x135   :  { %v346_v42 = vpop.permute.xlu0 %345  ;;  %v348_v45 = vpop.permute.xlu1 %347 }
 0x136   :  { %384 = vst.msk [vmem:[#allocation6 + $0x310] sm:$0xff] %vm146_vm2, %v346_v42  ;;  %385 = vst.msk [vmem:[#allocation6 + $0x318] sm:$0xff] %vm146_vm2, %v348_v45 }
 0x139   :  { %v350_v44 = vpop.permute.xlu0 %349  ;;  %v352_v47 = vpop.permute.xlu1 %351 }
 0x13a   :  { %386 = vst.msk [vmem:[#allocation6 + $0x320] sm:$0xff] %vm146_vm2, %v350_v44  ;;  %387 = vst.msk [vmem:[#allocation6 + $0x328] sm:$0xff] %vm146_vm2, %v352_v47 }
 0x13d   :  { %v354_v46 = vpop.permute.xlu0 %353  ;;  %v356_v49 = vpop.permute.xlu1 %355 }
 0x13e   :  { %388 = vst.msk [vmem:[#allocation6 + $0x330] sm:$0xff] %vm146_vm2, %v354_v46  ;;  %389 = vst.msk [vmem:[#allocation6 + $0x338] sm:$0xff] %vm146_vm2, %v356_v49 }
 0x141   :  { %v456_v48 = vpop.permute.xlu0 %455  ;;  %v458_v51 = vpop.permute.xlu1 %457 }
 0x142   :  { %504 = vst.msk [vmem:[#allocation6 + $0x140] sm:$0xff] %vm146_vm2, %v456_v48  ;;  %505 = vst.msk [vmem:[#allocation6 + $0x148] sm:$0xff] %vm146_vm2, %v458_v51 }
 0x145   :  { %v460_v50 = vpop.permute.xlu0 %459  ;;  %v462_v53 = vpop.permute.xlu1 %461 }
 0x146   :  { %506 = vst.msk [vmem:[#allocation6 + $0x150] sm:$0xff] %vm146_vm2, %v460_v50  ;;  %507 = vst.msk [vmem:[#allocation6 + $0x158] sm:$0xff] %vm146_vm2, %v462_v53 }
 0x149   :  { %v464_v52 = vpop.permute.xlu0 %463  ;;  %v466_v55 = vpop.permute.xlu1 %465 }
 0x14a   :  { %508 = vst.msk [vmem:[#allocation6 + $0x160] sm:$0xff] %vm146_vm2, %v464_v52  ;;  %509 = vst.msk [vmem:[#allocation6 + $0x168] sm:$0xff] %vm146_vm2, %v466_v55 }
 0x14d   :  { %v468_v54 = vpop.permute.xlu0 %467  ;;  %v470_v57 = vpop.permute.xlu1 %469 }
 0x14e   :  { %510 = vst.msk [vmem:[#allocation6 + $0x170] sm:$0xff] %vm146_vm2, %v468_v54  ;;  %511 = vst.msk [vmem:[#allocation6 + $0x178] sm:$0xff] %vm146_vm2, %v470_v57 }
 0x151   :  { %v472_v56 = vpop.permute.xlu0 %471  ;;  %v474_v59 = vpop.permute.xlu1 %473 }
 0x152   :  { %512 = vst.msk [vmem:[#allocation6 + $0x380] sm:$0xff] %vm146_vm2, %v472_v56  ;;  %513 = vst.msk [vmem:[#allocation6 + $0x388] sm:$0xff] %vm146_vm2, %v474_v59 }
 0x155   :  { %v476_v58 = vpop.permute.xlu0 %475  ;;  %v478_v61 = vpop.permute.xlu1 %477 }
 0x156   :  { %514 = vst.msk [vmem:[#allocation6 + $0x390] sm:$0xff] %vm146_vm2, %v476_v58  ;;  %515 = vst.msk [vmem:[#allocation6 + $0x398] sm:$0xff] %vm146_vm2, %v478_v61 }
 0x159   :  { %v480_v60 = vpop.permute.xlu0 %479  ;;  %v482_v63 = vpop.permute.xlu1 %481 }
 0x15a   :  { %516 = vst.msk [vmem:[#allocation6 + $0x3a0] sm:$0xff] %vm146_vm2, %v480_v60  ;;  %517 = vst.msk [vmem:[#allocation6 + $0x3a8] sm:$0xff] %vm146_vm2, %v482_v63 }
 0x15d   :  { %v484_v62 = vpop.permute.xlu0 %483  ;;  %v486_v1 = vpop.permute.xlu1 %485 }
 0x15e   :  { %518 = vst.msk [vmem:[#allocation6 + $0x3b0] sm:$0xff] %vm146_vm2, %v484_v62  ;;  %519 = vst.msk [vmem:[#allocation6 + $0x3b8] sm:$0xff] %vm146_vm2, %v486_v1 }
 0x161   :  { %v586_v0 = vpop.permute.xlu0 %585  ;;  %v588_v3 = vpop.permute.xlu1 %587 }
 0x162   :  { %634 = vst.msk [vmem:[#allocation6 + $0x1c0] sm:$0xff] %vm146_vm2, %v586_v0  ;;  %635 = vst.msk [vmem:[#allocation6 + $0x1c8] sm:$0xff] %vm146_vm2, %v588_v3 }
 0x165   :  { %v590_v2 = vpop.permute.xlu0 %589  ;;  %v592_v5 = vpop.permute.xlu1 %591 }
 0x166   :  { %636 = vst.msk [vmem:[#allocation6 + $0x1d0] sm:$0xff] %vm146_vm2, %v590_v2  ;;  %637 = vst.msk [vmem:[#allocation6 + $0x1d8] sm:$0xff] %vm146_vm2, %v592_v5 }
 0x169   :  { %v594_v4 = vpop.permute.xlu0 %593  ;;  %v596_v7 = vpop.permute.xlu1 %595 }
 0x16a   :  { %638 = vst.msk [vmem:[#allocation6 + $0x1e0] sm:$0xff] %vm146_vm2, %v594_v4  ;;  %639 = vst.msk [vmem:[#allocation6 + $0x1e8] sm:$0xff] %vm146_vm2, %v596_v7 }
 0x16d   :  { %v598_v6 = vpop.permute.xlu0 %597  ;;  %v600_v9 = vpop.permute.xlu1 %599 }
 0x16e   :  { %640 = vst.msk [vmem:[#allocation6 + $0x1f0] sm:$0xff] %vm146_vm2, %v598_v6  ;;  %641 = vst.msk [vmem:[#allocation6 + $0x1f8] sm:$0xff] %vm146_vm2, %v600_v9 }
 0x171   :  { %v602_v8 = vpop.permute.xlu0 %601  ;;  %v604_v11 = vpop.permute.xlu1 %603 }
 0x172   :  { %642 = vst.msk [vmem:[#allocation6 + $0x400] sm:$0xff] %vm146_vm2, %v602_v8  ;;  %643 = vst.msk [vmem:[#allocation6 + $0x408] sm:$0xff] %vm146_vm2, %v604_v11 }
 0x175   :  { %v606_v10 = vpop.permute.xlu0 %605  ;;  %v608_v13 = vpop.permute.xlu1 %607 }
 0x176   :  { %644 = vst.msk [vmem:[#allocation6 + $0x410] sm:$0xff] %vm146_vm2, %v606_v10  ;;  %645 = vst.msk [vmem:[#allocation6 + $0x418] sm:$0xff] %vm146_vm2, %v608_v13 }
 0x179   :  { %v610_v12 = vpop.permute.xlu0 %609  ;;  %v612_v15 = vpop.permute.xlu1 %611 }
 0x17a   :  { %646 = vst.msk [vmem:[#allocation6 + $0x420] sm:$0xff] %vm146_vm2, %v610_v12  ;;  %647 = vst.msk [vmem:[#allocation6 + $0x428] sm:$0xff] %vm146_vm2, %v612_v15 }
 0x17d   :  { %v614_v14 = vpop.permute.xlu0 %613  ;;  %v616_v17 = vpop.permute.xlu1 %615 }
 0x17e   :  { %648 = vst.msk [vmem:[#allocation6 + $0x430] sm:$0xff] %vm146_vm2, %v614_v14  ;;  %649 = vst.msk [vmem:[#allocation6 + $0x438] sm:$0xff] %vm146_vm2, %v616_v17 }
 0x181   :  { %v683_v16 = vpop.permute.xlu0 %682  ;;  %v685_v19 = vpop.permute.xlu1 %684 }
 0x182   :  { %731 = vst.msk [vmem:[#allocation6 + $0x200] sm:$0xff] %vm146_vm2, %v683_v16  ;;  %732 = vst.msk [vmem:[#allocation6 + $0x208] sm:$0xff] %vm146_vm2, %v685_v19 }
 0x185   :  { %v687_v18 = vpop.permute.xlu0 %686  ;;  %v689_v21 = vpop.permute.xlu1 %688 }
 0x186   :  { %733 = vst.msk [vmem:[#allocation6 + $0x210] sm:$0xff] %vm146_vm2, %v687_v18  ;;  %734 = vst.msk [vmem:[#allocation6 + $0x218] sm:$0xff] %vm146_vm2, %v689_v21 }
 0x189   :  { %v691_v20 = vpop.permute.xlu0 %690  ;;  %v693_v23 = vpop.permute.xlu1 %692 }
 0x18a   :  { %735 = vst.msk [vmem:[#allocation6 + $0x220] sm:$0xff] %vm146_vm2, %v691_v20  ;;  %736 = vst.msk [vmem:[#allocation6 + $0x228] sm:$0xff] %vm146_vm2, %v693_v23 }
 0x18d   :  { %v695_v22 = vpop.permute.xlu0 %694  ;;  %v697_v25 = vpop.permute.xlu1 %696 }
 0x18e   :  { %737 = vst.msk [vmem:[#allocation6 + $0x230] sm:$0xff] %vm146_vm2, %v695_v22  ;;  %738 = vst.msk [vmem:[#allocation6 + $0x238] sm:$0xff] %vm146_vm2, %v697_v25 }
 0x191   :  { %v699_v24 = vpop.permute.xlu0 %698  ;;  %v701_v27 = vpop.permute.xlu1 %700 }
 0x192   :  { %739 = vst.msk [vmem:[#allocation6 + $0x440] sm:$0xff] %vm146_vm2, %v699_v24  ;;  %740 = vst.msk [vmem:[#allocation6 + $0x448] sm:$0xff] %vm146_vm2, %v701_v27 }
 0x195   :  { %v703_v26 = vpop.permute.xlu0 %702  ;;  %v705_v30 = vpop.permute.xlu1 %704 }
 0x196   :  { %741 = vst.msk [vmem:[#allocation6 + $0x450] sm:$0xff] %vm146_vm2, %v703_v26  ;;  %742 = vst.msk [vmem:[#allocation6 + $0x458] sm:$0xff] %vm146_vm2, %v705_v30 }
 0x199   :  { %v707_v28 = vpop.permute.xlu0 %706  ;;  %v709_v31 = vpop.permute.xlu1 %708 }
 0x19a   :  { %743 = vst.msk [vmem:[#allocation6 + $0x460] sm:$0xff] %vm146_vm2, %v707_v28  ;;  %744 = vst.msk [vmem:[#allocation6 + $0x468] sm:$0xff] %vm146_vm2, %v709_v31 }
 0x19d   :  { %v711_v29 = vpop.permute.xlu0 %710  ;;  %v713_v32 = vpop.permute.xlu1 %712 }
 0x19e   :  { %745 = vst.msk [vmem:[#allocation6 + $0x470] sm:$0xff] %vm146_vm2, %v711_v29  ;;  %746 = vst.msk [vmem:[#allocation6 + $0x478] sm:$0xff] %vm146_vm2, %v713_v32 }
 0x19f   :  { %803 = shalt.err (!%p800_p9)
}
 0x1a0   :  { %758 = dma.vmem_to_hbm [thread:$0]  %s753_s16, 18432, %s1297_s1, [#allocation5], %s817_s9, %s817_s9, %s818_s10  }
 0x1a1   :  { %814 = dma.done.wait [#allocation5], 18432  }
 0x1a2   :  { %815 = vsyncadd [#allocation5], 4294948864 }
 0x1a3   :  { %762 = vsyncpa [#allocation4], 1 }
 0x1a4   :  { %763 = vsyncpa [#allocation5], 1 }

</bundles_post_ra>
